<compile_context>
chip_gen: v5e
topology: v5e:2x2
jax: 0.10.0
libtpu: 0.0.40
codegen_flags: <defaults>
</compile_context>

<pallas_src>
import functools

import jax
import jax.numpy as jnp
from jax import lax
from jax.experimental import pallas as pl
from jax.experimental.pallas import tpu as pltpu


def _round_up(x, m):
    return (x + m - 1) // m * m


def _charbert_kernel(x_ref, ids_ref, wi_ref, whf_ref, whb_ref, bi_ref, bhn_ref,
                     out_ref, gi_ref, hid_ref, *, seq_len):
    # x_ref   : (1, L_pad*B_tile, Din)  time-major rows: row = t*B_tile + b
    # ids_ref : (B_tile, 2S, 1)         stacked [start; end] positions
    # wi_ref  : (Din, 6Hh)              fused fwd|bwd input weights, [r, z, n]
    # whf/whb : (Hh, 3Hh)               per-direction hidden weights
    # bi_ref  : (1, 6Hh)                fused input bias (r/z hidden biases folded)
    # bhn_ref : (1, 2Hh)                n-gate hidden biases [fwd | bwd]
    # out_ref : (B_tile, S, 4Hh)
    # gi_ref  : (L_pad*B_tile, 6Hh) scratch; hid_ref : (L_pad*B_tile, 2Hh) scratch
    Hh = whf_ref.shape[0]
    B_tile, S2, _ = ids_ref.shape
    S = S2 // 2
    rows = x_ref.shape[1]
    L_pad = rows // B_tile
    L = seq_len

    # (1) Fused forward+backward input projection for the whole tile: a single
    #     MXU pass over x; r/z hidden biases are already folded into bi.
    x2d = x_ref[0]                                             # (L_pad*B_tile, Din)
    gi_ref[...] = (
        jnp.dot(x2d, wi_ref[...], preferred_element_type=jnp.float32) + bi_ref[...]
    )

    # If the time axis was padded, zero the hidden scratch so the epilogue
    # one-hot matmul never reads uninitialized VMEM.
    if L_pad != L:
        hid_ref[...] = jnp.zeros_like(hid_ref)

    whf = whf_ref[...]
    whb = whb_ref[...]
    bhn_f = bhn_ref[:, 0:Hh]
    bhn_b = bhn_ref[:, Hh:2 * Hh]

    # (2) Interleaved forward/backward GRU recurrence over the real length L.
    def step(i, carry):
        h_f, h_b = carry
        t_b = L - 1 - i
        row_f = pl.multiple_of(i * B_tile, B_tile)
        row_b = pl.multiple_of(t_b * B_tile, B_tile)
        gi_f = gi_ref[pl.ds(row_f, B_tile), :]                 # (B_tile, 6Hh)
        gi_b = gi_ref[pl.ds(row_b, B_tile), :]

        # Two independent recurrence matmuls issued back to back.
        gh_f = jnp.dot(h_f, whf, preferred_element_type=jnp.float32)   # (B_tile, 3Hh)
        gh_b = jnp.dot(h_b, whb, preferred_element_type=jnp.float32)

        r_f = jax.nn.sigmoid(gi_f[:, 0:Hh] + gh_f[:, 0:Hh])
        z_f = jax.nn.sigmoid(gi_f[:, Hh:2 * Hh] + gh_f[:, Hh:2 * Hh])
        n_f = jnp.tanh(gi_f[:, 2 * Hh:3 * Hh] + r_f * (gh_f[:, 2 * Hh:3 * Hh] + bhn_f))
        h_f_new = (1.0 - z_f) * n_f + z_f * h_f

        r_b = jax.nn.sigmoid(gi_b[:, 3 * Hh:4 * Hh] + gh_b[:, 0:Hh])
        z_b = jax.nn.sigmoid(gi_b[:, 4 * Hh:5 * Hh] + gh_b[:, Hh:2 * Hh])
        n_b = jnp.tanh(gi_b[:, 5 * Hh:6 * Hh] + r_b * (gh_b[:, 2 * Hh:3 * Hh] + bhn_b))
        h_b_new = (1.0 - z_b) * n_b + z_b * h_b

        # Aligned (B_tile, Hh) slab stores: fwd -> lanes [0:Hh), bwd -> [Hh:2Hh).
        hid_ref[pl.ds(row_f, B_tile), 0:Hh] = h_f_new
        hid_ref[pl.ds(row_b, B_tile), Hh:2 * Hh] = h_b_new
        return (h_f_new, h_b_new)

    h0 = jnp.zeros((B_tile, Hh), jnp.float32)
    lax.fori_loop(0, L, step, (h0, h0))

    # (3) Gather epilogue: one stacked [start; end] one-hot matmul per batch
    #     row against that row's strided (L_pad, 2Hh) hidden slab.
    lane = lax.broadcasted_iota(jnp.int32, (S2, L_pad), 1)
    for b in range(B_tile):                      # static unroll; B_tile is small
        oh = (ids_ref[b] == lane).astype(jnp.float32)              # (2S, L_pad)
        hid_b = hid_ref[pl.ds(b, L_pad, stride=B_tile), :]         # (L_pad, 2Hh)
        res = jnp.dot(oh, hid_b, preferred_element_type=jnp.float32)  # (2S, 2Hh)
        out_ref[b, :, 0:2 * Hh] = res[0:S, :]            # start_hidden
        out_ref[b, :, 2 * Hh:4 * Hh] = res[S:S2, :]      # end_hidden


def charbert_embeddings(char_input_ids, start_ids, end_ids, params):
    B, L = char_input_ids.shape
    S = start_ids.shape[1]
    Din = params["emb"].shape[1]
    Hh = params["w_hh_f"].shape[1]
    out_dim = 4 * Hh  # == hidden_size

    B_tile = min(_round_up(B, 8), 128)
    B_pad = _round_up(B, B_tile)
    L_pad = _round_up(L, 8)
    grid_b = B_pad // B_tile

    # Embedding gather (vocab-table lookup) is JAX glue.
    x = params["emb"][char_input_ids].astype(jnp.float32)          # (B, L, Din)

    # Time-major, batch-tiled, flattened layout: x_blocks[g, t*B_tile + b, :].
    x_t = jnp.transpose(x, (1, 0, 2))                              # (L, B, Din)
    x_t = jnp.pad(x_t, ((0, L_pad - L), (0, B_pad - B), (0, 0)))
    x_blocks = (x_t.reshape(L_pad, grid_b, B_tile, Din)
                .transpose(1, 0, 2, 3)
                .reshape(grid_b, L_pad * B_tile, Din))

    # Stacked [start; end] ids with a trailing unit dim: (B_pad, 2S, 1).
    ids = jnp.concatenate([start_ids, end_ids], axis=1).astype(jnp.int32)
    ids = jnp.pad(ids, ((0, B_pad - B), (0, 0)))[..., None]

    # Fused weights / biases (gate order inside each direction is [r, z, n]).
    wi = jnp.concatenate([params["w_ih_f"].T, params["w_ih_b"].T], axis=1)  # (Din, 6Hh)
    whf = params["w_hh_f"].T                                                # (Hh, 3Hh)
    whb = params["w_hh_b"].T

    def _fold(b_ih, b_hh):
        # r/z: b_ih + b_hh folded into gi; n: only b_ih (b_hn applied in-loop).
        return jnp.concatenate([b_ih[:2 * Hh] + b_hh[:2 * Hh], b_ih[2 * Hh:]])

    bias_i = jnp.concatenate(
        [_fold(params["b_ih_f"], params["b_hh_f"]),
         _fold(params["b_ih_b"], params["b_hh_b"])]).reshape(1, 6 * Hh)
    bhn = jnp.concatenate(
        [params["b_hh_f"][2 * Hh:], params["b_hh_b"][2 * Hh:]]).reshape(1, 2 * Hh)

    kernel = functools.partial(_charbert_kernel, seq_len=L)

    grid_spec = pltpu.PrefetchScalarGridSpec(
        num_scalar_prefetch=0,
        grid=(grid_b,),
        in_specs=[
            pl.BlockSpec((1, L_pad * B_tile, Din), lambda g: (g, 0, 0)),
            pl.BlockSpec((B_tile, 2 * S, 1), lambda g: (g, 0, 0)),
            pl.BlockSpec((Din, 6 * Hh), lambda g: (0, 0)),
            pl.BlockSpec((Hh, 3 * Hh), lambda g: (0, 0)),
            pl.BlockSpec((Hh, 3 * Hh), lambda g: (0, 0)),
            pl.BlockSpec((1, 6 * Hh), lambda g: (0, 0)),
            pl.BlockSpec((1, 2 * Hh), lambda g: (0, 0)),
        ],
        out_specs=pl.BlockSpec((B_tile, S, out_dim), lambda g: (g, 0, 0)),
        scratch_shapes=[
            pltpu.VMEM((L_pad * B_tile, 6 * Hh), jnp.float32),   # fused gi (fwd|bwd)
            pltpu.VMEM((L_pad * B_tile, 2 * Hh), jnp.float32),   # hidden states
        ],
    )

    out = pl.pallas_call(
        kernel,
        out_shape=jax.ShapeDtypeStruct((B_pad, S, out_dim), jnp.float32),
        grid_spec=grid_spec,
        compiler_params=pltpu.CompilerParams(dimension_semantics=("parallel",)),
    )(x_blocks, ids, wi, whf, whb, bias_i, bhn)
    return out[:B]


def init_params(key, hidden_size=32, char_vocab_size=1025, padding_idx=1024):
    Din = hidden_size // 2      # char_embedding_size
    Hh = hidden_size // 4       # GRU hidden size per direction
    keys = jax.random.split(key, 9)
    k = 1.0 / (Hh ** 0.5)

    def u(kk, shape):
        return jax.random.uniform(kk, shape, jnp.float32, -k, k)

    emb = jax.random.normal(keys[0], (char_vocab_size, Din), jnp.float32)
    emb = emb.at[padding_idx].set(0.0)   # nn.Embedding padding_idx row is zero

    return dict(
        emb=emb,
        w_ih_f=u(keys[1], (3 * Hh, Din)),
        w_hh_f=u(keys[2], (3 * Hh, Hh)),
        b_ih_f=u(keys[3], (3 * Hh,)),
        b_hh_f=u(keys[4], (3 * Hh,)),
        w_ih_b=u(keys[5], (3 * Hh, Din)),
        w_hh_b=u(keys[6], (3 * Hh, Hh)),
        b_ih_b=u(keys[7], (3 * Hh,)),
        b_hh_b=u(keys[8], (3 * Hh,)),
    )


# ---------------- pure-JAX reference (mirrors torch.nn.GRU semantics) --------

def _gru_dir_ref(x, w_ih, w_hh, b_ih, b_hh, reverse):
    Hh = w_hh.shape[1]
    gi = x @ w_ih.T + b_ih
    if reverse:
        gi = gi[::-1]

    def step(h, gi_t):
        gh = h @ w_hh.T + b_hh
        r = jax.nn.sigmoid(gi_t[:Hh] + gh[:Hh])
        z = jax.nn.sigmoid(gi_t[Hh:2 * Hh] + gh[Hh:2 * Hh])
        n = jnp.tanh(gi_t[2 * Hh:] + r * gh[2 * Hh:])
        h_new = (1.0 - z) * n + z * h
        return h_new, h_new

    _, hs = lax.scan(step, jnp.zeros((Hh,), jnp.float32), gi)
    if reverse:
        hs = hs[::-1]
    return hs


def reference_forward(char_ids, start_ids, end_ids, p):
    x = p["emb"][char_ids].astype(jnp.float32)

    def per_batch(xb):
        hf = _gru_dir_ref(xb, p["w_ih_f"], p["w_hh_f"], p["b_ih_f"], p["b_hh_f"], False)
        hb = _gru_dir_ref(xb, p["w_ih_b"], p["w_hh_b"], p["b_ih_b"], p["b_hh_b"], True)
        return jnp.concatenate([hf, hb], axis=-1)

    all_h = jax.vmap(per_batch)(x)                                  # (B, L, 2Hh)
    L = char_ids.shape[1]
    s_oh = jax.nn.one_hot(start_ids, L, dtype=jnp.float32)
    e_oh = jax.nn.one_hot(end_ids, L, dtype=jnp.float32)
    sh = jnp.einsum("bsl,bld->bsd", s_oh, all_h)
    eh = jnp.einsum("bsl,bld->bsd", e_oh, all_h)
    return jnp.concatenate([sh, eh], axis=-1)


if __name__ == "__main__":
    hidden_size = 32
    B, L, S = 2, 16, 8

    key = jax.random.PRNGKey(0)
    kp, k1, k2, k3 = jax.random.split(key, 4)
    params = init_params(kp, hidden_size)

    char_input_ids = jax.random.randint(k1, (B, L), 0, 1025, dtype=jnp.int32)
    char_input_ids = char_input_ids.at[:, -2:].set(1024)   # some padding chars
    start_ids = jax.random.randint(k2, (B, S), 0, L, dtype=jnp.int32)
    end_ids = jnp.minimum(
        start_ids + jax.random.randint(k3, (B, S), 0, 4, dtype=jnp.int32), L - 1)

    out = charbert_embeddings(char_input_ids, start_ids, end_ids, params)
    out = jax.block_until_ready(out)

    ref = reference_forward(char_input_ids, start_ids, end_ids, params)
    assert out.shape == (B, S, hidden_size)
    err = float(jnp.max(jnp.abs(out - ref)))
    assert jnp.allclose(out, ref, atol=2e-4, rtol=2e-4), err

    print("KERNEL_OK")
</pallas_src>

<mosaic_0001>
module attributes {stable_mosaic.version = 11 : i64} {
  func.func @_charbert_kernel(%arg0: i32, %arg1: memref<1x128x16xf32, #tpu.memory_space<vmem>>, %arg2: memref<8x16x1xi32, #tpu.memory_space<vmem>>, %arg3: memref<16x48xf32, #tpu.memory_space<vmem>>, %arg4: memref<8x24xf32, #tpu.memory_space<vmem>>, %arg5: memref<8x24xf32, #tpu.memory_space<vmem>>, %arg6: memref<1x48xf32, #tpu.memory_space<vmem>>, %arg7: memref<1x16xf32, #tpu.memory_space<vmem>>, %arg8: memref<8x8x32xf32, #tpu.memory_space<vmem>>, %arg9: memref<128x48xf32, #tpu.memory_space<vmem>>, %arg10: memref<128x16xf32, #tpu.memory_space<vmem>>) attributes {dimension_semantics = [#tpu.dimension_semantics<parallel>], iteration_bounds = array<i64: 1>, scalar_prefetch = 0 : i64, scratch_operands = 2 : i64, tpu.core_type = #tpu.core_type<tc>, window_params = [{transform_indices = @transform_0, window_bounds = array<i64: 1, 128, 16>}, {transform_indices = @transform_1, window_bounds = array<i64: 8, 16, 1>}, {pipeline_mode = #tpu.pipeline_mode<synchronous>, transform_indices = @transform_2, window_bounds = array<i64: 16, 48>}, {pipeline_mode = #tpu.pipeline_mode<synchronous>, transform_indices = @transform_3, window_bounds = array<i64: 8, 24>}, {pipeline_mode = #tpu.pipeline_mode<synchronous>, transform_indices = @transform_4, window_bounds = array<i64: 8, 24>}, {pipeline_mode = #tpu.pipeline_mode<synchronous>, transform_indices = @transform_5, window_bounds = array<i64: 1, 48>}, {pipeline_mode = #tpu.pipeline_mode<synchronous>, transform_indices = @transform_6, window_bounds = array<i64: 1, 16>}, {transform_indices = @transform_7, window_bounds = array<i64: 8, 8, 32>}]} {
    %c0 = arith.constant 0 : index
    %c0_0 = arith.constant 0 : index
    %c0_1 = arith.constant 0 : index
    %0 = vector.load %arg1[%c0, %c0_0, %c0_1] : memref<1x128x16xf32, #tpu.memory_space<vmem>>, vector<1x128x16xf32>
    %1 = vector.shape_cast %0 : vector<1x128x16xf32> to vector<128x16xf32>
    %c0_2 = arith.constant 0 : index
    %c0_3 = arith.constant 0 : index
    %2 = vector.load %arg3[%c0_2, %c0_3] : memref<16x48xf32, #tpu.memory_space<vmem>>, vector<16x48xf32>
    %cst = arith.constant dense<0.000000e+00> : vector<128x48xf32>
    %3 = tpu.matmul %1, %2, %cst {dimension_numbers = #tpu.dot_dimension_numbers<[1], [0], [0], [1], [0, 0, 1, 1], [], []>} : vector<128x16xf32>, vector<16x48xf32>, vector<128x48xf32> -> vector<128x48xf32>
    %c0_4 = arith.constant 0 : index
    %c0_5 = arith.constant 0 : index
    %4 = vector.load %arg6[%c0_4, %c0_5] : memref<1x48xf32, #tpu.memory_space<vmem>>, vector<1x48xf32>
    %5 = vector.broadcast %4 : vector<1x48xf32> to vector<128x48xf32>
    %6 = arith.addf %3, %5 : vector<128x48xf32>
    %c0_6 = arith.constant 0 : index
    %c0_7 = arith.constant 0 : index
    %7 = vector.load %arg9[%c0_6, %c0_7] : memref<128x48xf32, #tpu.memory_space<vmem>>, vector<128x48xf32>
    tpu.vector_store %arg9[%c0_6, %c0_7], %6 {strides = array<i32>} : memref<128x48xf32, #tpu.memory_space<vmem>>, vector<128x48xf32>,
    %c0_8 = arith.constant 0 : index
    %c0_9 = arith.constant 0 : index
    %8 = vector.load %arg4[%c0_8, %c0_9] : memref<8x24xf32, #tpu.memory_space<vmem>>, vector<8x24xf32>
    %c0_10 = arith.constant 0 : index
    %c0_11 = arith.constant 0 : index
    %9 = vector.load %arg5[%c0_10, %c0_11] : memref<8x24xf32, #tpu.memory_space<vmem>>, vector<8x24xf32>
    %c0_12 = arith.constant 0 : index
    %c0_13 = arith.constant 0 : index
    %10 = vector.load %arg7[%c0_12, %c0_13] : memref<1x16xf32, #tpu.memory_space<vmem>>, vector<1x8xf32>
    %c0_14 = arith.constant 0 : index
    %c8 = arith.constant 8 : index
    %11 = vector.load %arg7[%c0_14, %c8] : memref<1x16xf32, #tpu.memory_space<vmem>>, vector<1x8xf32>
    %cst_15 = arith.constant 0.000000e+00 : f32
    %12 = vector.broadcast %cst_15 : f32 to vector<8x8xf32>
    %c0_i32 = arith.constant 0 : i32
    %c16_i32 = arith.constant 16 : i32
    %13 = arith.addi %c0_i32, %c16_i32 : i32
    %c1_i32 = arith.constant 1 : i32
    %14:2 = scf.for %arg11 = %c0_i32 to %13 step %c1_i32 iter_args(%arg12 = %12, %arg13 = %12) -> (vector<8x8xf32>, vector<8x8xf32>)  : i32 {
      %c15_i32 = arith.constant 15 : i32
      %144 = arith.subi %c15_i32, %arg11 : i32
      %c8_i32 = arith.constant 8 : i32
      %145 = arith.muli %arg11, %c8_i32 : i32
      %146 = tpu.assume_multiple %145, 8 : i32
      %c8_i32_105 = arith.constant 8 : i32
      %147 = arith.muli %144, %c8_i32_105 : i32
      %148 = tpu.assume_multiple %147, 8 : i32
      %149 = arith.index_cast %146 : i32 to index
      %c0_106 = arith.constant 0 : index
      %150 = vector.load %arg9[%149, %c0_106] : memref<128x48xf32, #tpu.memory_space<vmem>>, vector<8x48xf32>
      %151 = arith.index_cast %148 : i32 to index
      %c0_107 = arith.constant 0 : index
      %152 = vector.load %arg9[%151, %c0_107] : memref<128x48xf32, #tpu.memory_space<vmem>>, vector<8x48xf32>
      %cst_108 = arith.constant dense<0.000000e+00> : vector<8x24xf32>
      %153 = tpu.matmul %arg12, %8, %cst_108 {dimension_numbers = #tpu.dot_dimension_numbers<[1], [0], [0], [1], [0, 0, 1, 1], [], []>} : vector<8x8xf32>, vector<8x24xf32>, vector<8x24xf32> -> vector<8x24xf32>
      %cst_109 = arith.constant dense<0.000000e+00> : vector<8x24xf32>
      %154 = tpu.matmul %arg13, %9, %cst_109 {dimension_numbers = #tpu.dot_dimension_numbers<[1], [0], [0], [1], [0, 0, 1, 1], [], []>} : vector<8x8xf32>, vector<8x24xf32>, vector<8x24xf32> -> vector<8x24xf32>
      %155 = vector.extract_strided_slice %150 {offsets = [0, 0], sizes = [8, 8], strides = [1, 1]} : vector<8x48xf32> to vector<8x8xf32>
      %156 = vector.extract_strided_slice %153 {offsets = [0, 0], sizes = [8, 8], strides = [1, 1]} : vector<8x24xf32> to vector<8x8xf32>
      %157 = arith.addf %155, %156 : vector<8x8xf32>
      %158 = arith.negf %157 : vector<8x8xf32>
      %159 = math.exp %158 : vector<8x8xf32>
      %cst_110 = arith.constant 1.000000e+00 : f32
      %160 = vector.broadcast %cst_110 : f32 to vector<8x8xf32>
      %161 = arith.addf %160, %159 : vector<8x8xf32>
      %162 = arith.divf %160, %161 : vector<8x8xf32>
      %163 = vector.extract_strided_slice %150 {offsets = [0, 8], sizes = [8, 8], strides = [1, 1]} : vector<8x48xf32> to vector<8x8xf32>
      %164 = vector.extract_strided_slice %153 {offsets = [0, 8], sizes = [8, 8], strides = [1, 1]} : vector<8x24xf32> to vector<8x8xf32>
      %165 = arith.addf %163, %164 : vector<8x8xf32>
      %166 = arith.negf %165 : vector<8x8xf32>
      %167 = math.exp %166 : vector<8x8xf32>
      %cst_111 = arith.constant 1.000000e+00 : f32
      %168 = vector.broadcast %cst_111 : f32 to vector<8x8xf32>
      %169 = arith.addf %168, %167 : vector<8x8xf32>
      %170 = arith.divf %168, %169 : vector<8x8xf32>
      %171 = vector.extract_strided_slice %150 {offsets = [0, 16], sizes = [8, 8], strides = [1, 1]} : vector<8x48xf32> to vector<8x8xf32>
      %172 = vector.extract_strided_slice %153 {offsets = [0, 16], sizes = [8, 8], strides = [1, 1]} : vector<8x24xf32> to vector<8x8xf32>
      %173 = vector.broadcast %10 : vector<1x8xf32> to vector<8x8xf32>
      %174 = arith.addf %172, %173 : vector<8x8xf32>
      %175 = arith.mulf %162, %174 : vector<8x8xf32>
      %176 = arith.addf %171, %175 : vector<8x8xf32>
      %177 = math.tanh %176 : vector<8x8xf32>
      %cst_112 = arith.constant 1.000000e+00 : f32
      %178 = vector.broadcast %cst_112 : f32 to vector<8x8xf32>
      %179 = arith.subf %178, %170 : vector<8x8xf32>
      %180 = arith.mulf %179, %177 : vector<8x8xf32>
      %181 = arith.mulf %170, %arg12 : vector<8x8xf32>
      %182 = arith.addf %180, %181 : vector<8x8xf32>
      %183 = vector.extract_strided_slice %152 {offsets = [0, 24], sizes = [8, 8], strides = [1, 1]} : vector<8x48xf32> to vector<8x8xf32>
      %184 = vector.extract_strided_slice %154 {offsets = [0, 0], sizes = [8, 8], strides = [1, 1]} : vector<8x24xf32> to vector<8x8xf32>
      %185 = arith.addf %183, %184 : vector<8x8xf32>
      %186 = arith.negf %185 : vector<8x8xf32>
      %187 = math.exp %186 : vector<8x8xf32>
      %cst_113 = arith.constant 1.000000e+00 : f32
      %188 = vector.broadcast %cst_113 : f32 to vector<8x8xf32>
      %189 = arith.addf %188, %187 : vector<8x8xf32>
      %190 = arith.divf %188, %189 : vector<8x8xf32>
      %191 = vector.extract_strided_slice %152 {offsets = [0, 32], sizes = [8, 8], strides = [1, 1]} : vector<8x48xf32> to vector<8x8xf32>
      %192 = vector.extract_strided_slice %154 {offsets = [0, 8], sizes = [8, 8], strides = [1, 1]} : vector<8x24xf32> to vector<8x8xf32>
      %193 = arith.addf %191, %192 : vector<8x8xf32>
      %194 = arith.negf %193 : vector<8x8xf32>
      %195 = math.exp %194 : vector<8x8xf32>
      %cst_114 = arith.constant 1.000000e+00 : f32
      %196 = vector.broadcast %cst_114 : f32 to vector<8x8xf32>
      %197 = arith.addf %196, %195 : vector<8x8xf32>
      %198 = arith.divf %196, %197 : vector<8x8xf32>
      %199 = vector.extract_strided_slice %152 {offsets = [0, 40], sizes = [8, 8], strides = [1, 1]} : vector<8x48xf32> to vector<8x8xf32>
      %200 = vector.extract_strided_slice %154 {offsets = [0, 16], sizes = [8, 8], strides = [1, 1]} : vector<8x24xf32> to vector<8x8xf32>
      %201 = vector.broadcast %11 : vector<1x8xf32> to vector<8x8xf32>
      %202 = arith.addf %200, %201 : vector<8x8xf32>
      %203 = arith.mulf %190, %202 : vector<8x8xf32>
      %204 = arith.addf %199, %203 : vector<8x8xf32>
      %205 = math.tanh %204 : vector<8x8xf32>
      %cst_115 = arith.constant 1.000000e+00 : f32
      %206 = vector.broadcast %cst_115 : f32 to vector<8x8xf32>
      %207 = arith.subf %206, %198 : vector<8x8xf32>
      %208 = arith.mulf %207, %205 : vector<8x8xf32>
      %209 = arith.mulf %198, %arg13 : vector<8x8xf32>
      %210 = arith.addf %208, %209 : vector<8x8xf32>
      %211 = arith.index_cast %146 : i32 to index
      %c0_116 = arith.constant 0 : index
      %212 = vector.load %arg10[%211, %c0_116] : memref<128x16xf32, #tpu.memory_space<vmem>>, vector<8x8xf32>
      tpu.vector_store %arg10[%211, %c0_116], %182 {strides = array<i32>} : memref<128x16xf32, #tpu.memory_space<vmem>>, vector<8x8xf32>,
      %213 = arith.index_cast %148 : i32 to index
      %c8_117 = arith.constant 8 : index
      %214 = vector.load %arg10[%213, %c8_117] : memref<128x16xf32, #tpu.memory_space<vmem>>, vector<8x8xf32>
      tpu.vector_store %arg10[%213, %c8_117], %210 {strides = array<i32>} : memref<128x16xf32, #tpu.memory_space<vmem>>, vector<8x8xf32>,
      scf.yield %182, %210 : vector<8x8xf32>, vector<8x8xf32>
    }
    %c16_i32_16 = arith.constant 16 : i32
    %15 = tpu.iota {dimensions = array<i32: 1>} : vector<16x16xi32>
    %c0_17 = arith.constant 0 : index
    %c0_18 = arith.constant 0 : index
    %c0_19 = arith.constant 0 : index
    %16 = vector.load %arg2[%c0_17, %c0_18, %c0_19] : memref<8x16x1xi32, #tpu.memory_space<vmem>>, vector<1x16x1xi32>
    %17 = vector.shape_cast %16 : vector<1x16x1xi32> to vector<16x1xi32>
    %18 = vector.broadcast %17 : vector<16x1xi32> to vector<16x16xi32>
    %19 = arith.cmpi eq, %18, %15 : vector<16x16xi32>
    %20 = arith.extui %19 : vector<16x16xi1> to vector<16x16xi32>
    %21 = arith.sitofp %20 : vector<16x16xi32> to vector<16x16xf32>
    %c0_20 = arith.constant 0 : index
    %c0_21 = arith.constant 0 : index
    %22 = tpu.strided_load %arg10[%c0_20, %c0_21] {strides = array<i32: 8, 1>} : memref<128x16xf32, #tpu.memory_space<vmem>>, vector<16x16xf32>
    %cst_22 = arith.constant dense<0.000000e+00> : vector<16x16xf32>
    %23 = tpu.matmul %21, %22, %cst_22 {dimension_numbers = #tpu.dot_dimension_numbers<[1], [0], [0], [1], [0, 0, 1, 1], [], []>} : vector<16x16xf32>, vector<16x16xf32>, vector<16x16xf32> -> vector<16x16xf32>
    %24 = vector.extract_strided_slice %23 {offsets = [0, 0], sizes = [8, 16], strides = [1, 1]} : vector<16x16xf32> to vector<8x16xf32>
    %c0_23 = arith.constant 0 : index
    %c0_24 = arith.constant 0 : index
    %c0_25 = arith.constant 0 : index
    %25 = vector.load %arg8[%c0_23, %c0_24, %c0_25] : memref<8x8x32xf32, #tpu.memory_space<vmem>>, vector<1x8x16xf32>
    %26 = vector.shape_cast %25 : vector<1x8x16xf32> to vector<8x16xf32>
    %27 = vector.shape_cast %24 : vector<8x16xf32> to vector<1x8x16xf32>
    tpu.vector_store %arg8[%c0_23, %c0_24, %c0_25], %27 {strides = array<i32>} : memref<8x8x32xf32, #tpu.memory_space<vmem>>, vector<1x8x16xf32>,
    %28 = vector.extract_strided_slice %23 {offsets = [8, 0], sizes = [8, 16], strides = [1, 1]} : vector<16x16xf32> to vector<8x16xf32>
    %c0_26 = arith.constant 0 : index
    %c0_27 = arith.constant 0 : index
    %c16 = arith.constant 16 : index
    %29 = vector.load %arg8[%c0_26, %c0_27, %c16] : memref<8x8x32xf32, #tpu.memory_space<vmem>>, vector<1x8x16xf32>
    %30 = vector.shape_cast %29 : vector<1x8x16xf32> to vector<8x16xf32>
    %31 = vector.shape_cast %28 : vector<8x16xf32> to vector<1x8x16xf32>
    tpu.vector_store %arg8[%c0_26, %c0_27, %c16], %31 {strides = array<i32>} : memref<8x8x32xf32, #tpu.memory_space<vmem>>, vector<1x8x16xf32>,
    %c1 = arith.constant 1 : index
    %c0_28 = arith.constant 0 : index
    %c0_29 = arith.constant 0 : index
    %32 = vector.load %arg2[%c1, %c0_28, %c0_29] : memref<8x16x1xi32, #tpu.memory_space<vmem>>, vector<1x16x1xi32>
    %33 = vector.shape_cast %32 : vector<1x16x1xi32> to vector<16x1xi32>
    %34 = vector.broadcast %33 : vector<16x1xi32> to vector<16x16xi32>
    %35 = arith.cmpi eq, %34, %15 : vector<16x16xi32>
    %36 = arith.extui %35 : vector<16x16xi1> to vector<16x16xi32>
    %37 = arith.sitofp %36 : vector<16x16xi32> to vector<16x16xf32>
    %c1_30 = arith.constant 1 : index
    %c0_31 = arith.constant 0 : index
    %38 = tpu.strided_load %arg10[%c1_30, %c0_31] {strides = array<i32: 8, 1>} : memref<128x16xf32, #tpu.memory_space<vmem>>, vector<16x16xf32>
    %cst_32 = arith.constant dense<0.000000e+00> : vector<16x16xf32>
    %39 = tpu.matmul %37, %38, %cst_32 {dimension_numbers = #tpu.dot_dimension_numbers<[1], [0], [0], [1], [0, 0, 1, 1], [], []>} : vector<16x16xf32>, vector<16x16xf32>, vector<16x16xf32> -> vector<16x16xf32>
    %40 = vector.extract_strided_slice %39 {offsets = [0, 0], sizes = [8, 16], strides = [1, 1]} : vector<16x16xf32> to vector<8x16xf32>
    %c1_33 = arith.constant 1 : index
    %c0_34 = arith.constant 0 : index
    %c0_35 = arith.constant 0 : index
    %41 = vector.load %arg8[%c1_33, %c0_34, %c0_35] : memref<8x8x32xf32, #tpu.memory_space<vmem>>, vector<1x8x16xf32>
    %42 = vector.shape_cast %41 : vector<1x8x16xf32> to vector<8x16xf32>
    %43 = vector.shape_cast %40 : vector<8x16xf32> to vector<1x8x16xf32>
    tpu.vector_store %arg8[%c1_33, %c0_34, %c0_35], %43 {strides = array<i32>} : memref<8x8x32xf32, #tpu.memory_space<vmem>>, vector<1x8x16xf32>,
    %44 = vector.extract_strided_slice %39 {offsets = [8, 0], sizes = [8, 16], strides = [1, 1]} : vector<16x16xf32> to vector<8x16xf32>
    %c1_36 = arith.constant 1 : index
    %c0_37 = arith.constant 0 : index
    %c16_38 = arith.constant 16 : index
    %45 = vector.load %arg8[%c1_36, %c0_37, %c16_38] : memref<8x8x32xf32, #tpu.memory_space<vmem>>, vector<1x8x16xf32>
    %46 = vector.shape_cast %45 : vector<1x8x16xf32> to vector<8x16xf32>
    %47 = vector.shape_cast %44 : vector<8x16xf32> to vector<1x8x16xf32>
    tpu.vector_store %arg8[%c1_36, %c0_37, %c16_38], %47 {strides = array<i32>} : memref<8x8x32xf32, #tpu.memory_space<vmem>>, vector<1x8x16xf32>,
    %c2 = arith.constant 2 : index
    %c0_39 = arith.constant 0 : index
    %c0_40 = arith.constant 0 : index
    %48 = vector.load %arg2[%c2, %c0_39, %c0_40] : memref<8x16x1xi32, #tpu.memory_space<vmem>>, vector<1x16x1xi32>
    %49 = vector.shape_cast %48 : vector<1x16x1xi32> to vector<16x1xi32>
    %50 = vector.broadcast %49 : vector<16x1xi32> to vector<16x16xi32>
    %51 = arith.cmpi eq, %50, %15 : vector<16x16xi32>
    %52 = arith.extui %51 : vector<16x16xi1> to vector<16x16xi32>
    %53 = arith.sitofp %52 : vector<16x16xi32> to vector<16x16xf32>
    %c2_41 = arith.constant 2 : index
    %c0_42 = arith.constant 0 : index
    %54 = tpu.strided_load %arg10[%c2_41, %c0_42] {strides = array<i32: 8, 1>} : memref<128x16xf32, #tpu.memory_space<vmem>>, vector<16x16xf32>
    %cst_43 = arith.constant dense<0.000000e+00> : vector<16x16xf32>
    %55 = tpu.matmul %53, %54, %cst_43 {dimension_numbers = #tpu.dot_dimension_numbers<[1], [0], [0], [1], [0, 0, 1, 1], [], []>} : vector<16x16xf32>, vector<16x16xf32>, vector<16x16xf32> -> vector<16x16xf32>
    %56 = vector.extract_strided_slice %55 {offsets = [0, 0], sizes = [8, 16], strides = [1, 1]} : vector<16x16xf32> to vector<8x16xf32>
    %c2_44 = arith.constant 2 : index
    %c0_45 = arith.constant 0 : index
    %c0_46 = arith.constant 0 : index
    %57 = vector.load %arg8[%c2_44, %c0_45, %c0_46] : memref<8x8x32xf32, #tpu.memory_space<vmem>>, vector<1x8x16xf32>
    %58 = vector.shape_cast %57 : vector<1x8x16xf32> to vector<8x16xf32>
    %59 = vector.shape_cast %56 : vector<8x16xf32> to vector<1x8x16xf32>
    tpu.vector_store %arg8[%c2_44, %c0_45, %c0_46], %59 {strides = array<i32>} : memref<8x8x32xf32, #tpu.memory_space<vmem>>, vector<1x8x16xf32>,
    %60 = vector.extract_strided_slice %55 {offsets = [8, 0], sizes = [8, 16], strides = [1, 1]} : vector<16x16xf32> to vector<8x16xf32>
    %c2_47 = arith.constant 2 : index
    %c0_48 = arith.constant 0 : index
    %c16_49 = arith.constant 16 : index
    %61 = vector.load %arg8[%c2_47, %c0_48, %c16_49] : memref<8x8x32xf32, #tpu.memory_space<vmem>>, vector<1x8x16xf32>
    %62 = vector.shape_cast %61 : vector<1x8x16xf32> to vector<8x16xf32>
    %63 = vector.shape_cast %60 : vector<8x16xf32> to vector<1x8x16xf32>
    tpu.vector_store %arg8[%c2_47, %c0_48, %c16_49], %63 {strides = array<i32>} : memref<8x8x32xf32, #tpu.memory_space<vmem>>, vector<1x8x16xf32>,
    %c3 = arith.constant 3 : index
    %c0_50 = arith.constant 0 : index
    %c0_51 = arith.constant 0 : index
    %64 = vector.load %arg2[%c3, %c0_50, %c0_51] : memref<8x16x1xi32, #tpu.memory_space<vmem>>, vector<1x16x1xi32>
    %65 = vector.shape_cast %64 : vector<1x16x1xi32> to vector<16x1xi32>
    %66 = vector.broadcast %65 : vector<16x1xi32> to vector<16x16xi32>
    %67 = arith.cmpi eq, %66, %15 : vector<16x16xi32>
    %68 = arith.extui %67 : vector<16x16xi1> to vector<16x16xi32>
    %69 = arith.sitofp %68 : vector<16x16xi32> to vector<16x16xf32>
    %c3_52 = arith.constant 3 : index
    %c0_53 = arith.constant 0 : index
    %70 = tpu.strided_load %arg10[%c3_52, %c0_53] {strides = array<i32: 8, 1>} : memref<128x16xf32, #tpu.memory_space<vmem>>, vector<16x16xf32>
    %cst_54 = arith.constant dense<0.000000e+00> : vector<16x16xf32>
    %71 = tpu.matmul %69, %70, %cst_54 {dimension_numbers = #tpu.dot_dimension_numbers<[1], [0], [0], [1], [0, 0, 1, 1], [], []>} : vector<16x16xf32>, vector<16x16xf32>, vector<16x16xf32> -> vector<16x16xf32>
    %72 = vector.extract_strided_slice %71 {offsets = [0, 0], sizes = [8, 16], strides = [1, 1]} : vector<16x16xf32> to vector<8x16xf32>
    %c3_55 = arith.constant 3 : index
    %c0_56 = arith.constant 0 : index
    %c0_57 = arith.constant 0 : index
    %73 = vector.load %arg8[%c3_55, %c0_56, %c0_57] : memref<8x8x32xf32, #tpu.memory_space<vmem>>, vector<1x8x16xf32>
    %74 = vector.shape_cast %73 : vector<1x8x16xf32> to vector<8x16xf32>
    %75 = vector.shape_cast %72 : vector<8x16xf32> to vector<1x8x16xf32>
    tpu.vector_store %arg8[%c3_55, %c0_56, %c0_57], %75 {strides = array<i32>} : memref<8x8x32xf32, #tpu.memory_space<vmem>>, vector<1x8x16xf32>,
    %76 = vector.extract_strided_slice %71 {offsets = [8, 0], sizes = [8, 16], strides = [1, 1]} : vector<16x16xf32> to vector<8x16xf32>
    %c3_58 = arith.constant 3 : index
    %c0_59 = arith.constant 0 : index
    %c16_60 = arith.constant 16 : index
    %77 = vector.load %arg8[%c3_58, %c0_59, %c16_60] : memref<8x8x32xf32, #tpu.memory_space<vmem>>, vector<1x8x16xf32>
    %78 = vector.shape_cast %77 : vector<1x8x16xf32> to vector<8x16xf32>
    %79 = vector.shape_cast %76 : vector<8x16xf32> to vector<1x8x16xf32>
    tpu.vector_store %arg8[%c3_58, %c0_59, %c16_60], %79 {strides = array<i32>} : memref<8x8x32xf32, #tpu.memory_space<vmem>>, vector<1x8x16xf32>,
    %c4 = arith.constant 4 : index
    %c0_61 = arith.constant 0 : index
    %c0_62 = arith.constant 0 : index
    %80 = vector.load %arg2[%c4, %c0_61, %c0_62] : memref<8x16x1xi32, #tpu.memory_space<vmem>>, vector<1x16x1xi32>
    %81 = vector.shape_cast %80 : vector<1x16x1xi32> to vector<16x1xi32>
    %82 = vector.broadcast %81 : vector<16x1xi32> to vector<16x16xi32>
    %83 = arith.cmpi eq, %82, %15 : vector<16x16xi32>
    %84 = arith.extui %83 : vector<16x16xi1> to vector<16x16xi32>
    %85 = arith.sitofp %84 : vector<16x16xi32> to vector<16x16xf32>
    %c4_63 = arith.constant 4 : index
    %c0_64 = arith.constant 0 : index
    %86 = tpu.strided_load %arg10[%c4_63, %c0_64] {strides = array<i32: 8, 1>} : memref<128x16xf32, #tpu.memory_space<vmem>>, vector<16x16xf32>
    %cst_65 = arith.constant dense<0.000000e+00> : vector<16x16xf32>
    %87 = tpu.matmul %85, %86, %cst_65 {dimension_numbers = #tpu.dot_dimension_numbers<[1], [0], [0], [1], [0, 0, 1, 1], [], []>} : vector<16x16xf32>, vector<16x16xf32>, vector<16x16xf32> -> vector<16x16xf32>
    %88 = vector.extract_strided_slice %87 {offsets = [0, 0], sizes = [8, 16], strides = [1, 1]} : vector<16x16xf32> to vector<8x16xf32>
    %c4_66 = arith.constant 4 : index
    %c0_67 = arith.constant 0 : index
    %c0_68 = arith.constant 0 : index
    %89 = vector.load %arg8[%c4_66, %c0_67, %c0_68] : memref<8x8x32xf32, #tpu.memory_space<vmem>>, vector<1x8x16xf32>
    %90 = vector.shape_cast %89 : vector<1x8x16xf32> to vector<8x16xf32>
    %91 = vector.shape_cast %88 : vector<8x16xf32> to vector<1x8x16xf32>
    tpu.vector_store %arg8[%c4_66, %c0_67, %c0_68], %91 {strides = array<i32>} : memref<8x8x32xf32, #tpu.memory_space<vmem>>, vector<1x8x16xf32>,
    %92 = vector.extract_strided_slice %87 {offsets = [8, 0], sizes = [8, 16], strides = [1, 1]} : vector<16x16xf32> to vector<8x16xf32>
    %c4_69 = arith.constant 4 : index
    %c0_70 = arith.constant 0 : index
    %c16_71 = arith.constant 16 : index
    %93 = vector.load %arg8[%c4_69, %c0_70, %c16_71] : memref<8x8x32xf32, #tpu.memory_space<vmem>>, vector<1x8x16xf32>
    %94 = vector.shape_cast %93 : vector<1x8x16xf32> to vector<8x16xf32>
    %95 = vector.shape_cast %92 : vector<8x16xf32> to vector<1x8x16xf32>
    tpu.vector_store %arg8[%c4_69, %c0_70, %c16_71], %95 {strides = array<i32>} : memref<8x8x32xf32, #tpu.memory_space<vmem>>, vector<1x8x16xf32>,
    %c5 = arith.constant 5 : index
    %c0_72 = arith.constant 0 : index
    %c0_73 = arith.constant 0 : index
    %96 = vector.load %arg2[%c5, %c0_72, %c0_73] : memref<8x16x1xi32, #tpu.memory_space<vmem>>, vector<1x16x1xi32>
    %97 = vector.shape_cast %96 : vector<1x16x1xi32> to vector<16x1xi32>
    %98 = vector.broadcast %97 : vector<16x1xi32> to vector<16x16xi32>
    %99 = arith.cmpi eq, %98, %15 : vector<16x16xi32>
    %100 = arith.extui %99 : vector<16x16xi1> to vector<16x16xi32>
    %101 = arith.sitofp %100 : vector<16x16xi32> to vector<16x16xf32>
    %c5_74 = arith.constant 5 : index
    %c0_75 = arith.constant 0 : index
    %102 = tpu.strided_load %arg10[%c5_74, %c0_75] {strides = array<i32: 8, 1>} : memref<128x16xf32, #tpu.memory_space<vmem>>, vector<16x16xf32>
    %cst_76 = arith.constant dense<0.000000e+00> : vector<16x16xf32>
    %103 = tpu.matmul %101, %102, %cst_76 {dimension_numbers = #tpu.dot_dimension_numbers<[1], [0], [0], [1], [0, 0, 1, 1], [], []>} : vector<16x16xf32>, vector<16x16xf32>, vector<16x16xf32> -> vector<16x16xf32>
    %104 = vector.extract_strided_slice %103 {offsets = [0, 0], sizes = [8, 16], strides = [1, 1]} : vector<16x16xf32> to vector<8x16xf32>
    %c5_77 = arith.constant 5 : index
    %c0_78 = arith.constant 0 : index
    %c0_79 = arith.constant 0 : index
    %105 = vector.load %arg8[%c5_77, %c0_78, %c0_79] : memref<8x8x32xf32, #tpu.memory_space<vmem>>, vector<1x8x16xf32>
    %106 = vector.shape_cast %105 : vector<1x8x16xf32> to vector<8x16xf32>
    %107 = vector.shape_cast %104 : vector<8x16xf32> to vector<1x8x16xf32>
    tpu.vector_store %arg8[%c5_77, %c0_78, %c0_79], %107 {strides = array<i32>} : memref<8x8x32xf32, #tpu.memory_space<vmem>>, vector<1x8x16xf32>,
    %108 = vector.extract_strided_slice %103 {offsets = [8, 0], sizes = [8, 16], strides = [1, 1]} : vector<16x16xf32> to vector<8x16xf32>
    %c5_80 = arith.constant 5 : index
    %c0_81 = arith.constant 0 : index
    %c16_82 = arith.constant 16 : index
    %109 = vector.load %arg8[%c5_80, %c0_81, %c16_82] : memref<8x8x32xf32, #tpu.memory_space<vmem>>, vector<1x8x16xf32>
    %110 = vector.shape_cast %109 : vector<1x8x16xf32> to vector<8x16xf32>
    %111 = vector.shape_cast %108 : vector<8x16xf32> to vector<1x8x16xf32>
    tpu.vector_store %arg8[%c5_80, %c0_81, %c16_82], %111 {strides = array<i32>} : memref<8x8x32xf32, #tpu.memory_space<vmem>>, vector<1x8x16xf32>,
    %c6 = arith.constant 6 : index
    %c0_83 = arith.constant 0 : index
    %c0_84 = arith.constant 0 : index
    %112 = vector.load %arg2[%c6, %c0_83, %c0_84] : memref<8x16x1xi32, #tpu.memory_space<vmem>>, vector<1x16x1xi32>
    %113 = vector.shape_cast %112 : vector<1x16x1xi32> to vector<16x1xi32>
    %114 = vector.broadcast %113 : vector<16x1xi32> to vector<16x16xi32>
    %115 = arith.cmpi eq, %114, %15 : vector<16x16xi32>
    %116 = arith.extui %115 : vector<16x16xi1> to vector<16x16xi32>
    %117 = arith.sitofp %116 : vector<16x16xi32> to vector<16x16xf32>
    %c6_85 = arith.constant 6 : index
    %c0_86 = arith.constant 0 : index
    %118 = tpu.strided_load %arg10[%c6_85, %c0_86] {strides = array<i32: 8, 1>} : memref<128x16xf32, #tpu.memory_space<vmem>>, vector<16x16xf32>
    %cst_87 = arith.constant dense<0.000000e+00> : vector<16x16xf32>
    %119 = tpu.matmul %117, %118, %cst_87 {dimension_numbers = #tpu.dot_dimension_numbers<[1], [0], [0], [1], [0, 0, 1, 1], [], []>} : vector<16x16xf32>, vector<16x16xf32>, vector<16x16xf32> -> vector<16x16xf32>
    %120 = vector.extract_strided_slice %119 {offsets = [0, 0], sizes = [8, 16], strides = [1, 1]} : vector<16x16xf32> to vector<8x16xf32>
    %c6_88 = arith.constant 6 : index
    %c0_89 = arith.constant 0 : index
    %c0_90 = arith.constant 0 : index
    %121 = vector.load %arg8[%c6_88, %c0_89, %c0_90] : memref<8x8x32xf32, #tpu.memory_space<vmem>>, vector<1x8x16xf32>
    %122 = vector.shape_cast %121 : vector<1x8x16xf32> to vector<8x16xf32>
    %123 = vector.shape_cast %120 : vector<8x16xf32> to vector<1x8x16xf32>
    tpu.vector_store %arg8[%c6_88, %c0_89, %c0_90], %123 {strides = array<i32>} : memref<8x8x32xf32, #tpu.memory_space<vmem>>, vector<1x8x16xf32>,
    %124 = vector.extract_strided_slice %119 {offsets = [8, 0], sizes = [8, 16], strides = [1, 1]} : vector<16x16xf32> to vector<8x16xf32>
    %c6_91 = arith.constant 6 : index
    %c0_92 = arith.constant 0 : index
    %c16_93 = arith.constant 16 : index
    %125 = vector.load %arg8[%c6_91, %c0_92, %c16_93] : memref<8x8x32xf32, #tpu.memory_space<vmem>>, vector<1x8x16xf32>
    %126 = vector.shape_cast %125 : vector<1x8x16xf32> to vector<8x16xf32>
    %127 = vector.shape_cast %124 : vector<8x16xf32> to vector<1x8x16xf32>
    tpu.vector_store %arg8[%c6_91, %c0_92, %c16_93], %127 {strides = array<i32>} : memref<8x8x32xf32, #tpu.memory_space<vmem>>, vector<1x8x16xf32>,
    %c7 = arith.constant 7 : index
    %c0_94 = arith.constant 0 : index
    %c0_95 = arith.constant 0 : index
    %128 = vector.load %arg2[%c7, %c0_94, %c0_95] : memref<8x16x1xi32, #tpu.memory_space<vmem>>, vector<1x16x1xi32>
    %129 = vector.shape_cast %128 : vector<1x16x1xi32> to vector<16x1xi32>
    %130 = vector.broadcast %129 : vector<16x1xi32> to vector<16x16xi32>
    %131 = arith.cmpi eq, %130, %15 : vector<16x16xi32>
    %132 = arith.extui %131 : vector<16x16xi1> to vector<16x16xi32>
    %133 = arith.sitofp %132 : vector<16x16xi32> to vector<16x16xf32>
    %c7_96 = arith.constant 7 : index
    %c0_97 = arith.constant 0 : index
    %134 = tpu.strided_load %arg10[%c7_96, %c0_97] {strides = array<i32: 8, 1>} : memref<128x16xf32, #tpu.memory_space<vmem>>, vector<16x16xf32>
    %cst_98 = arith.constant dense<0.000000e+00> : vector<16x16xf32>
    %135 = tpu.matmul %133, %134, %cst_98 {dimension_numbers = #tpu.dot_dimension_numbers<[1], [0], [0], [1], [0, 0, 1, 1], [], []>} : vector<16x16xf32>, vector<16x16xf32>, vector<16x16xf32> -> vector<16x16xf32>
    %136 = vector.extract_strided_slice %135 {offsets = [0, 0], sizes = [8, 16], strides = [1, 1]} : vector<16x16xf32> to vector<8x16xf32>
    %c7_99 = arith.constant 7 : index
    %c0_100 = arith.constant 0 : index
    %c0_101 = arith.constant 0 : index
    %137 = vector.load %arg8[%c7_99, %c0_100, %c0_101] : memref<8x8x32xf32, #tpu.memory_space<vmem>>, vector<1x8x16xf32>
    %138 = vector.shape_cast %137 : vector<1x8x16xf32> to vector<8x16xf32>
    %139 = vector.shape_cast %136 : vector<8x16xf32> to vector<1x8x16xf32>
    tpu.vector_store %arg8[%c7_99, %c0_100, %c0_101], %139 {strides = array<i32>} : memref<8x8x32xf32, #tpu.memory_space<vmem>>, vector<1x8x16xf32>,
    %140 = vector.extract_strided_slice %135 {offsets = [8, 0], sizes = [8, 16], strides = [1, 1]} : vector<16x16xf32> to vector<8x16xf32>
    %c7_102 = arith.constant 7 : index
    %c0_103 = arith.constant 0 : index
    %c16_104 = arith.constant 16 : index
    %141 = vector.load %arg8[%c7_102, %c0_103, %c16_104] : memref<8x8x32xf32, #tpu.memory_space<vmem>>, vector<1x8x16xf32>
    %142 = vector.shape_cast %141 : vector<1x8x16xf32> to vector<8x16xf32>
    %143 = vector.shape_cast %140 : vector<8x16xf32> to vector<1x8x16xf32>
    tpu.vector_store %arg8[%c7_102, %c0_103, %c16_104], %143 {strides = array<i32>} : memref<8x8x32xf32, #tpu.memory_space<vmem>>, vector<1x8x16xf32>,
    return
  }
  func.func @transform_0(%arg0: i32) -> (i32, i32, i32) {
    %c0_i32 = arith.constant 0 : i32
    %c0_i32_0 = arith.constant 0 : i32
    %c0_i32_1 = arith.constant 0 : i32
    return %arg0, %c0_i32, %c0_i32_0 : i32, i32, i32
  }
  func.func @transform_1(%arg0: i32) -> (i32, i32, i32) {
    %c0_i32 = arith.constant 0 : i32
    %c0_i32_0 = arith.constant 0 : i32
    %c0_i32_1 = arith.constant 0 : i32
    return %arg0, %c0_i32, %c0_i32_0 : i32, i32, i32
  }
  func.func @transform_2(%arg0: i32) -> (i32, i32) {
    %c0_i32 = arith.constant 0 : i32
    %c0_i32_0 = arith.constant 0 : i32
    %c0_i32_1 = arith.constant 0 : i32
    return %c0_i32, %c0_i32_0 : i32, i32
  }
  func.func @transform_3(%arg0: i32) -> (i32, i32) {
    %c0_i32 = arith.constant 0 : i32
    %c0_i32_0 = arith.constant 0 : i32
    %c0_i32_1 = arith.constant 0 : i32
    return %c0_i32, %c0_i32_0 : i32, i32
  }
  func.func @transform_4(%arg0: i32) -> (i32, i32) {
    %c0_i32 = arith.constant 0 : i32
    %c0_i32_0 = arith.constant 0 : i32
    %c0_i32_1 = arith.constant 0 : i32
    return %c0_i32, %c0_i32_0 : i32, i32
  }
  func.func @transform_5(%arg0: i32) -> (i32, i32) {
    %c0_i32 = arith.constant 0 : i32
    %c0_i32_0 = arith.constant 0 : i32
    %c0_i32_1 = arith.constant 0 : i32
    return %c0_i32, %c0_i32_0 : i32, i32
  }
  func.func @transform_6(%arg0: i32) -> (i32, i32) {
    %c0_i32 = arith.constant 0 : i32
    %c0_i32_0 = arith.constant 0 : i32
    %c0_i32_1 = arith.constant 0 : i32
    return %c0_i32, %c0_i32_0 : i32, i32
  }
  func.func @transform_7(%arg0: i32) -> (i32, i32, i32) {
    %c0_i32 = arith.constant 0 : i32
    %c0_i32_0 = arith.constant 0 : i32
    %c0_i32_1 = arith.constant 0 : i32
    return %arg0, %c0_i32, %c0_i32_0 : i32, i32, i32
  }
}

</mosaic_0001>

<bundles_post_ra>
// kernel: tpu_custom_call.1
= control target key start
LH: loop header
LB: loop body
LE: loop exit
PB: predicated region body
PF: predicated region fallthrough
CT: control target
= control target key end

     0   :  { %vm49_vm0 = vcmask 130048   ;;  %s1347_s0 = inlined_call_operand.vmem [shape: f32[1,128,16], index: 0, kind: input, shape index: {}]   ;;  %s1348_s1 = inlined_call_operand.vmem [shape: s32[8,16,1], index: 1, kind: input, shape index: {}]   ;;  %s1349_s2 = inlined_call_operand.vmem [shape: f32[16,48], index: 2, kind: input, shape index: {}]   ;;  %s1350_s3 = inlined_call_operand.vmem [shape: f32[8,24], index: 3, kind: input, shape index: {}]   ;;  %s1351_s4 = inlined_call_operand.vmem [shape: f32[8,24], index: 4, kind: input, shape index: {}]   ;;  %s1352_s5 = inlined_call_operand.vmem [shape: f32[1,48], index: 5, kind: input, shape index: {}]   ;;  %s1353_s6 = inlined_call_operand.vmem [shape: f32[1,16], index: 6, kind: input, shape index: {}]   ;;  %s1354_s7 = inlined_call_operand.hbm [shape: f32[8,8,32], index: 7, kind: output, shape index: {}]  }
   0x1   :  { %v44_v0 = vld [vmem:[%s1349_s2 + $0x8] sm:$0xff]  ;;  %v43_v1 = vld [vmem:[%s1349_s2] sm:$0xff] }
   0x2   :  { %932 = vmatpush.msra.mxu2 %v44_v0  ;;  %933 = vmatpush.msra.mxu3 %v44_v0  ;;  %v35_v2 = vld [vmem:[%s1347_s0 + $0x40] sm:$0xff] }
   0x3   :  { %v39_v3 = vld [vmem:[%s1347_s0 + $0x60] sm:$0xff] }
   0x4   :  { %12 = vsyncpa [#allocation5], 0  ;;  %112 = vmatpush.msra.mxu0 %v44_v0  ;;  %931 = vmatpush.msra.mxu1 %v44_v0  ;;  %v27_v4 = vld [vmem:[%s1347_s0] sm:$0xff]  ;;  %v36_v6 = vld [vmem:[%s1347_s0 + $0x48] sm:$0xff]  ;;  %vm163_vm1 = vcmask 392192   ;;  %v1197_v54 = vmov 0.0  }
   0x5   :  { %935 = vmatpush.msra.mxu2 %v43_v1  ;;  %936 = vmatpush.msra.mxu3 %v43_v1  ;;  %v31_v5 = vld [vmem:[%s1347_s0 + $0x20] sm:$0xff]  ;;  %v40_v7 = vld [vmem:[%s1347_s0 + $0x68] sm:$0xff]  ;;  %v37_v10 = vld [vmem:[%s1347_s0 + $0x50] sm:$0xff]  ;;  %v1199_v55 = vmov 0.0  }
   0x6   :  { %871 = vmatmul.msk.f32.vlgmr.msra.gmra.mxu2 %vm49_vm0, %v35_v2  ;;  %875 = vmatmul.msk.f32.vlgmr.msra.gmra.mxu3 %vm49_vm0, %v39_v3  ;;  %v28_v8 = vld [vmem:[%s1347_s0 + $0x8] sm:$0xff]  ;;  %v41_v11 = vld [vmem:[%s1347_s0 + $0x70] sm:$0xff]  ;;  %v38_v14 = vld [vmem:[%s1347_s0 + $0x58] sm:$0xff] }
   0x7   :  { %113 = vmatpush.msra.mxu0 %v43_v1  ;;  %934 = vmatpush.msra.mxu1 %v43_v1  ;;  %v32_v9 = vld [vmem:[%s1347_s0 + $0x28] sm:$0xff]  ;;  %v29_v12 = vld [vmem:[%s1347_s0 + $0x10] sm:$0xff]  ;;  %v42_v15 = vld [vmem:[%s1347_s0 + $0x78] sm:$0xff] }
   0x8   :  { %863 = vmatmul.msk.f32.vlgmr.msra.gmra.mxu0 %vm49_vm0, %v27_v4  ;;  %867 = vmatmul.msk.f32.vlgmr.msra.gmra.mxu1 %vm49_vm0, %v31_v5  ;;  %v33_v13 = vld [vmem:[%s1347_s0 + $0x30] sm:$0xff]  ;;  %v30_v16 = vld [vmem:[%s1347_s0 + $0x18] sm:$0xff]  ;;  %v974_v18 = vld [vmem:[%s1352_s5] ss:$0 sm:$0xff] }
   0x9   :  { %v34_v17 = vld [vmem:[%s1347_s0 + $0x38] sm:$0xff]  ;;  %v1169_v21 = vld [vmem:[%s1350_s3] sm:$0xff]  ;;  %s1201_s3 = smov 0  }
   0xa   :  { %v1174_v22 = vld [vmem:[%s1351_s4] sm:$0xff] }
   0xb   :  { %v1179_v23 = vld [vmem:[%s1353_s6] sm:$0x1] }
   0xe   :  { %872 = vmatmul.msk.f32.gmra.mxu2 %vm49_vm0, %v36_v6  ;;  %876 = vmatmul.msk.f32.gmra.mxu3 %vm49_vm0, %v40_v7 }
  0x10   :  { %864 = vmatmul.msk.f32.gmra.mxu0 %vm49_vm0, %v28_v8  ;;  %868 = vmatmul.msk.f32.gmra.mxu1 %vm49_vm0, %v32_v9 }
  0x16   :  { %873 = vmatmul.msk.f32.gmra.mxu2 %vm49_vm0, %v37_v10  ;;  %877 = vmatmul.msk.f32.gmra.mxu3 %vm49_vm0, %v41_v11 }
  0x18   :  { %865 = vmatmul.msk.f32.gmra.mxu0 %vm49_vm0, %v29_v12  ;;  %869 = vmatmul.msk.f32.gmra.mxu1 %vm49_vm0, %v33_v13 }
  0x1e   :  { %874 = vmatmul.msk.f32.gmra.mxu2 %vm49_vm0, %v38_v14  ;;  %878 = vmatmul.msk.f32.gmra.mxu3 %vm49_vm0, %v42_v15 }
  0x20   :  { %866 = vmatmul.msk.f32.gmra.mxu0 %vm49_vm0, %v30_v16  ;;  %870 = vmatmul.msk.f32.gmra.mxu1 %vm49_vm0, %v34_v17 }
  0x85   :  { %v115_v19 = vpop.f32.mrf.mxu0  ;;  %v127_v20 = vpop.f32.mrf.mxu1 }
  0x86   :  { %v116_v24 = vadd.f32 %v974_v18, %v115_v19  ;;  %v128_v25 = vadd.f32 %v974_v18, %v127_v20 }
  0x88   :  { %164 = vst.msk [vmem:[#allocation2] sm:$0xff] %vm163_vm1, %v116_v24 }
  0x89   :  { %168 = vst.msk [vmem:[#allocation2 + $0x20] sm:$0xff] %vm163_vm1, %v128_v25  ;;  %v139_v26 = vpop.f32.mrf.mxu2  ;;  %v151_v27 = vpop.f32.mrf.mxu3 }
  0x8a   :  { %v140_v28 = vadd.f32 %v974_v18, %v139_v26  ;;  %v152_v29 = vadd.f32 %v974_v18, %v151_v27 }
  0x8c   :  { %172 = vst.msk [vmem:[#allocation2 + $0x40] sm:$0xff] %vm163_vm1, %v140_v28 }
  0x8d   :  { %176 = vst.msk [vmem:[#allocation2 + $0x60] sm:$0xff] %vm163_vm1, %v152_v29  ;;  %v118_v30 = vpop.f32.mrf.mxu0  ;;  %v130_v31 = vpop.f32.mrf.mxu1 }
  0x8e   :  { %v119_v32 = vadd.f32 %v974_v18, %v118_v30  ;;  %v131_v33 = vadd.f32 %v974_v18, %v130_v31 }
  0x90   :  { %165 = vst.msk [vmem:[#allocation2 + $0x8] sm:$0xff] %vm163_vm1, %v119_v32 }
  0x91   :  { %169 = vst.msk [vmem:[#allocation2 + $0x28] sm:$0xff] %vm163_vm1, %v131_v33  ;;  %v142_v34 = vpop.f32.mrf.mxu2  ;;  %v154_v35 = vpop.f32.mrf.mxu3 }
  0x92   :  { %v143_v36 = vadd.f32 %v974_v18, %v142_v34  ;;  %v155_v37 = vadd.f32 %v974_v18, %v154_v35 }
  0x94   :  { %173 = vst.msk [vmem:[#allocation2 + $0x48] sm:$0xff] %vm163_vm1, %v143_v36 }
  0x95   :  { %177 = vst.msk [vmem:[#allocation2 + $0x68] sm:$0xff] %vm163_vm1, %v155_v37  ;;  %v121_v38 = vpop.f32.mrf.mxu0  ;;  %v133_v39 = vpop.f32.mrf.mxu1 }
  0x96   :  { %v122_v40 = vadd.f32 %v974_v18, %v121_v38  ;;  %v134_v41 = vadd.f32 %v974_v18, %v133_v39 }
  0x98   :  { %166 = vst.msk [vmem:[#allocation2 + $0x10] sm:$0xff] %vm163_vm1, %v122_v40 }
  0x99   :  { %170 = vst.msk [vmem:[#allocation2 + $0x30] sm:$0xff] %vm163_vm1, %v134_v41  ;;  %v145_v42 = vpop.f32.mrf.mxu2  ;;  %v157_v43 = vpop.f32.mrf.mxu3 }
  0x9a   :  { %v146_v44 = vadd.f32 %v974_v18, %v145_v42  ;;  %v158_v45 = vadd.f32 %v974_v18, %v157_v43 }
  0x9c   :  { %174 = vst.msk [vmem:[#allocation2 + $0x50] sm:$0xff] %vm163_vm1, %v146_v44 }
  0x9d   :  { %178 = vst.msk [vmem:[#allocation2 + $0x70] sm:$0xff] %vm163_vm1, %v158_v45  ;;  %v124_v46 = vpop.f32.mrf.mxu0  ;;  %v136_v47 = vpop.f32.mrf.mxu1 }
  0x9e   :  { %v125_v48 = vadd.f32 %v974_v18, %v124_v46  ;;  %v137_v49 = vadd.f32 %v974_v18, %v136_v47 }
  0xa0   :  { %167 = vst.msk [vmem:[#allocation2 + $0x18] sm:$0xff] %vm163_vm1, %v125_v48 }
  0xa1   :  { %171 = vst.msk [vmem:[#allocation2 + $0x38] sm:$0xff] %vm163_vm1, %v137_v49  ;;  %v148_v50 = vpop.f32.mrf.mxu2  ;;  %v160_v51 = vpop.f32.mrf.mxu3 }
  0xa2   :  { %v149_v52 = vadd.f32 %v974_v18, %v148_v50  ;;  %v161_v53 = vadd.f32 %v974_v18, %v160_v51 }
  0xa4   :  { %175 = vst.msk [vmem:[#allocation2 + $0x58] sm:$0xff] %vm163_vm1, %v149_v52 }
  0xa5   :  { %179 = vst.msk [vmem:[#allocation2 + $0x78] sm:$0xff] %vm163_vm1, %v161_v53 }
  0xa6 LB: > { %244 = vmatpush.msra.mxu1 %v1174_v22  ;;  %219 = vmatpush.msra.mxu0 %v1169_v21  ;;  %s1040_s4 = smov 96   ;;  %s1041_s5 = smov 120   ;;  %v270_v56 = vperm.slane %v1179_v23, 0  ;;  %vm201_vm2 = vcmask 64512   ;;  %vm352_vm11 = vcmask 130112   ;;  %s1038_s3 = sphi %s1201_s3, %s188_s3   ;;  %v1034_v55 = vphi %v1199_v55, %v293_v55   ;;  %v1030_v54 = vphi %v1197_v54, %v340_v54  }
  0xa7   : > { %225 = vrot.lane.b32.xlu0 %v1030_v54, %s1040_s4  ;;  %s1042_s6 = smov 16   ;;  %s1043_s19 = smov 8  }
  0xa8   : > { %271 = vrot.lane.b32.xlu1 %v270_v56, %s1042_s6  ;;  %s1044_s20 = smov 24   ;;  %s1045_s21 = smov 112  }
  0xa9   : > { %s879_s22 = sshll.u32 %s1038_s3, 3  ;;  %s191_s24 = ssub.s32 15, %s1038_s3 }
  0xaa   : > { %s194_s23 = scalar_lea.vmem [#allocation2], %s879_s22  ;;  %s1225_s25 = sshll.u32 %s191_s24, 3 }
  0xab   : > { %s196_s26 = scalar_lea.vmem [#allocation2], %s1225_s25  ;;  %s1046_s27 = smov 104  }
  0xac   : > { %v195_v1 = vld [vmem:[%s194_s23] sm:$0xff]  ;;  %s345_s28 = scalar_lea.vmem [#allocation3], %s879_s22  ;;  %s351_s29 = scalar_lea.vmem [#allocation3], %s1225_s25 }
  0xad   : > { %v197_v9 = vld [vmem:[%s196_s26] sm:$0xff]  ;;  %s188_s3 = sadd.s32 1, %s1038_s3  }
  0xae   : > { %p185_p0 = scmp.ge.s32.totalorder %s188_s3, 16  }
  0xaf   : > { %199 = vrot.lane.b32.xlu0 %v1034_v55, %s1041_s5  ;;  %v902_v21 = vld [vmem:[%s1348_s1 + $0x38] sm:$0xff] (%p185_p0)  ;;  %v901_v22 = vld [vmem:[%s1348_s1 + $0x30] sm:$0xff] (%p185_p0)  ;;  %s1050_s10 = smov (%p185_p0), [#allocation4]   ;;  %s832_s13 = sshll.u32 (%p185_p0), %s1354_s7, 4  ;;  %s833_s13 = int_to_ptr.hbm [resolvable:$true] %s832_s13 }
  0xb0   : > { %318 = vrot.lane.b32.xlu1 %v270_v56, %s1043_s19  ;;  %v889_v23 = vld [vmem:[%s1348_s1 + $0x10] sm:$0xff] (%p185_p0)  ;;  %s830_s2 = sshll.u32 (%p185_p0), %s1050_s10, 4  ;;  %s1051_s14 = smov (%p185_p0), 128   ;;  %s831_s2 = int_to_ptr.vmem [resolvable:$true] %s830_s2 }
  0xb1   :  { %s1052_s15 = smov (%p185_p0), 8  }
 0x119   : > { %v226_v57 = vpop.permute.xlu0 %225 }
 0x11a   : > { %882 = vmatmul.msk.f32.vlgmr.msra.gmra.mxu1 %vm201_vm2, %v226_v57  ;;  %v272_v59 = vpop.permute.xlu1 %271  ;;  %v896_v57 = vld [vmem:[%s1348_s1 + $0x28] sm:$0xff] (%p185_p0) }
 0x121   : > { %v200_v58 = vpop.permute.xlu0 %199 }
 0x122   : > { %881 = vmatmul.msk.f32.vlgmr.msra.gmra.mxu0 %vm201_vm2, %v200_v58  ;;  %v319_v60 = vpop.permute.xlu1 %318  ;;  %v895_v58 = vld [vmem:[%s1348_s1 + $0x20] sm:$0xff] (%p185_p0) }
 0x197   : > { %v246_v61 = vpop.f32.mrf.mxu1 }
 0x198   : > { %v321_v62 = vadd.f32 %v319_v60, %v246_v61  ;;  %295 = vrot.lane.b32.xlu2 %v246_v61, %s1044_s20  ;;  %v1047_v60 = vmov (%p185_p0), 0   ;;  %v890_v61 = vld [vmem:[%s1348_s1 + $0x18] sm:$0xff] (%p185_p0) }
 0x199   :  { %989 = vset.pattern.permute.xlu2 (%p185_p0), %v1047_v60  ;;  %988 = vset.pattern.permute.xlu1 (%p185_p0), %v1047_v60 }
 0x19a   : > { %323 = vrot.lane.b32.xlu0 %v321_v62, %s1043_s19  ;;  %v913_v62 = vld [vmem:[%s1348_s1 + $0x50] sm:$0xff] (%p185_p0) }
 0x19b   :  { %987 = vset.pattern.permute.xlu0 (%p185_p0), %v1047_v60 }
 0x19f   : > { %v221_v63 = vpop.f32.mrf.mxu0 }
 0x1a0   : > { %v274_v0 = vadd.f32 %v272_v59, %v221_v63  ;;  %v249_v2 = vadd.f32 %v221_v63, %v195_v1  ;;  %v356_v59 = vld [vmem:[%s1348_s1] sm:$0xff] (%p185_p0)  ;;  %v925_v63 = vld [vmem:[%s1348_s1 + $0x70] sm:$0xff] (%p185_p0) }
 0x1a2   : > { %276 = vrot.lane.b32.xlu2 %v274_v0, %s1045_s21  ;;  %v883_v3 = vmul.f32 -1.442695, %v249_v2  ;;  %v907_v0 = vld [vmem:[%s1348_s1 + $0x40] sm:$0xff] (%p185_p0)  ;;  %v920_v2 = vld [vmem:[%s1348_s1 + $0x68] sm:$0xff] (%p185_p0) }
 0x1a4   : > { %975 = vpow2.f32 %v883_v3  ;;  %v926_v3 = vld [vmem:[%s1348_s1 + $0x78] sm:$0xff] (%p185_p0) }
 0x1aa   : > { %v976_v4 = vpop.eup %975 }
 0x1ab   : > { %v253_v5 = vadd.f32 1.0, %v976_v4  ;;  %v914_v4 = vld [vmem:[%s1348_s1 + $0x58] sm:$0xff] (%p185_p0) }
 0x1ad   : > { %977 = vrcp.f32 %v253_v5  ;;  %vm259_vm3 = vweird.f32 %v253_v5  ;;  %v265_v13 = vand.u32 2147483648, %v253_v5  ;;  %v263_v16 = vand.u32 2147483647, %v253_v5 }
 0x1af   : > { %v266_v17 = vor.u32 1.1754944e-38, %v265_v13  ;;  %vm264_vm6 = vcmp.eq.f32.partialorder %v263_v16, 8.507059e+37 }
 0x1b3   : > { %v978_v6 = vpop.eup %977 }
 0x1b4   : > { %v255_v7 = vmul.f32 %v978_v6, %v253_v5  ;;  %vm260_vm4 = vweird.f32 %v978_v6 }
 0x1b5   : > { %vm261_vm5 = vmor %vm259_vm3, %vm260_vm4 }
 0x1b6   : > { %v256_v8 = vsub.f32 1.0, %v255_v7 }
 0x1b8   : > { %v257_v10 = vmul.f32 %v978_v6, %v256_v8 }
 0x1ba   : > { %v258_v15 = vadd.f32 %v978_v6, %v257_v10 }
 0x1bc   : > { %v262_v18 = vsel %vm261_vm5, %v978_v6, %v258_v15 }
 0x1bd   : > { %v267_v20 = vsel %vm264_vm6, %v266_v17, %v262_v18 }
 0x1be   : > { %v286_v49 = vsub.f32 1.0, %v267_v20  ;;  %v292_v51 = vmul.f32 %v1034_v55, %v267_v20 }
 0x1f2   : > { %v296_v11 = vpop.permute.xlu2 %295 }
 0x1f3   : > { %v298_v12 = vadd.f32 %v296_v11, %v197_v9 }
 0x1f5   : > { %v884_v14 = vmul.f32 -1.442695, %v298_v12 }
 0x1f7   : > { %979 = vpow2.f32 %v884_v14 }
 0x1fc   : > { %v277_v19 = vpop.permute.xlu2 %276 }
 0x1fd   : > { %v980_v24 = vpop.eup %979  ;;  %v279_v25 = vmul.f32 %v277_v19, %v267_v20 }
 0x1fe   : > { %v302_v26 = vadd.f32 1.0, %v980_v24 }
 0x1ff   : > { %281 = vrot.lane.b32.xlu1 %v279_v25, %s1042_s6 }
 0x200   : > { %981 = vrcp.f32 %v302_v26  ;;  %v314_v30 = vand.u32 2147483648, %v302_v26  ;;  %v312_v32 = vand.u32 2147483647, %v302_v26  ;;  %vm308_vm8 = vweird.f32 %v302_v26 }
 0x202   : > { %v315_v34 = vor.u32 1.1754944e-38, %v314_v30  ;;  %vm313_vm10 = vcmp.eq.f32.partialorder %v312_v32, 8.507059e+37 }
 0x206   : > { %v982_v27 = vpop.eup %981 }
 0x207   : > { %v304_v28 = vmul.f32 %v982_v27, %v302_v26  ;;  %vm309_vm7 = vweird.f32 %v982_v27 }
 0x208   : > { %vm310_vm9 = vmor %vm308_vm8, %vm309_vm7 }
 0x209   : > { %v305_v29 = vsub.f32 1.0, %v304_v28 }
 0x20b   : > { %v306_v31 = vmul.f32 %v982_v27, %v305_v29 }
 0x20c   : > { %v324_v37 = vpop.permute.xlu0 %323 }
 0x20d   : > { %v307_v33 = vadd.f32 %v982_v27, %v306_v31 }
 0x20f   : > { %v311_v35 = vsel %vm310_vm9, %v982_v27, %v307_v33 }
 0x210   : > { %v316_v36 = vsel %vm313_vm10, %v315_v34, %v311_v35 }
 0x211   : > { %v326_v38 = vmul.f32 %v324_v37, %v316_v36  ;;  %v333_v45 = vsub.f32 1.0, %v316_v36  ;;  %v339_v47 = vmul.f32 %v1030_v54, %v316_v36 }
 0x213   : > { %328 = vrot.lane.b32.xlu2 %v326_v38, %s1042_s6 }
 0x26d   : > { %v329_v39 = vpop.permute.xlu2 %328 }
 0x26e   : > { %v331_v40 = vadd.f32 %v329_v39, %v197_v9 }
 0x270   : > { %983 = vtanh.f32 %v331_v40 }
 0x271   : > { %v282_v41 = vpop.permute.xlu1 %281 }
 0x272   : > { %v284_v42 = vadd.f32 %v282_v41, %v195_v1  ;;  %v908_v1 = vld [vmem:[%s1348_s1 + $0x48] sm:$0xff] (%p185_p0) }
 0x274   : > { %985 = vtanh.f32 %v284_v42 }
 0x276   : > { %v984_v43 = vpop.eup %983 }
 0x277   : > { %335 = vrot.lane.b32.xlu1 %v984_v43, %s1041_s5 }
 0x27a   : > { %v986_v44 = vpop.eup %985 }
 0x27b   : > { %288 = vrot.lane.b32.xlu0 %v986_v44, %s1041_s5 }
 0x27f   :  { %359 = vperm.xlu1 (%p185_p0), %988, %v356_v59  }
 0x287   :  { %417 = vperm.xlu1 (%p185_p0), %988, %v889_v23  }
 0x28f   :  { %420 = vperm.xlu1 (%p185_p0), %988, %v890_v61  }
 0x297   :  { %594 = vperm.xlu1 (%p185_p0), %988, %v907_v0  }
 0x29f   :  { %774 = vperm.xlu1 (%p185_p0), %988, %v926_v3  }
 0x2e9   : > { %v336_v46 = vpop.permute.xlu1 %335 }
 0x2ea   : > { %v338_v48 = vmul.f32 %v336_v46, %v333_v45 }
 0x2ec   : > { %v340_v54 = vadd.f32 %v339_v47, %v338_v48  }
 0x2ed   : > { %v289_v50 = vpop.permute.xlu0 %288 }
 0x2ee   : > { %v291_v52 = vmul.f32 %v289_v50, %v286_v49  ;;  %348 = vrot.lane.b32.xlu0 %v340_v54, %s1046_s27  ;;  %v919_v54 = vld [vmem:[%s1348_s1 + $0x60] sm:$0xff] (%p185_p0)  ;;  %v354_v50 = vlaneseq (%p185_p0) }
 0x2f0   : > { %v293_v55 = vadd.f32 %v292_v51, %v291_v52   ;;  %v1294_v60 = vand.u32 (%p185_p0), 127, %v354_v50 }
 0x2f1   :  { %v360_v23 = vpop.permute.xlu1 (%p185_p0), %359 }
 0x2f2   : > { %342 = vrot.lane.b32.xlu2 %v293_v55, %s1041_s5  ;;  %v357_v55 = vld [vmem:[%s1348_s1 + $0x8] sm:$0xff] (%p185_p0)  ;;  %vm364_vm13 = vcmp.eq.s32.totalorder (%p185_p0), %v360_v23, %v1294_v60  ;;  %s1049_s1 = smov (%p185_p0), 16  }
 0x2f6   :  { %476 = vperm.xlu0 (%p185_p0), %987, %v895_v58  }
 0x2f9   :  { %v418_v0 = vpop.permute.xlu1 (%p185_p0), %417 }
 0x2fa   :  { %479 = vperm.xlu2 (%p185_p0), %989, %v896_v57   ;;  %vm422_vm1 = vcmp.eq.s32.totalorder (%p185_p0), %v418_v0, %v1294_v60 }
 0x2fe   :  { %535 = vperm.xlu0 (%p185_p0), %987, %v901_v22  }
 0x302   :  { %538 = vperm.xlu2 (%p185_p0), %989, %v902_v21  }
 0x306   :  { %362 = vperm.xlu0 (%p185_p0), %987, %v357_v55  }
 0x30a   :  { %712 = vperm.xlu2 (%p185_p0), %989, %v919_v54   ;;  %v1048_v54 = vmov (%p185_p0), 0.0  }
 0x30b   :  { %v885_v61 = vsel (%p185_p0), %vm364_vm13, 1.0, %v1048_v54  ;;  %vm411_vm13 = vcmask (%p185_p0), 261248  }
 0x30e   :  { %771 = vperm.xlu0 (%p185_p0), %987, %v925_v63  }
 0x312   :  { %653 = vperm.xlu2 (%p185_p0), %989, %v913_v62  }
 0x316   :  { %715 = vperm.xlu0 (%p185_p0), %987, %v920_v2   ;;  %v891_v2 = vsel (%p185_p0), %vm422_vm1, 1.0, %v1048_v54 }
 0x31a   :  { %597 = vperm.xlu2 (%p185_p0), %989, %v908_v1  }
 0x31e   :  { %656 = vperm.xlu0 (%p185_p0), %987, %v914_v4  }
 0x34c   : > { %v343_v53 = vpop.permute.xlu2 %342 }
 0x34d   : > { %346 = vst.msk [vmem:[%s345_s28] sm:$0xff] %vm201_vm2, %v343_v53 }
 0x354   :  { %v480_v38 = vpop.permute.xlu2 (%p185_p0), %479 }
 0x355   :  { %vm482_vm14 = vcmp.eq.s32.totalorder (%p185_p0), %v480_v38, %v1294_v60 }
 0x356   :  { %v898_v1 = vsel (%p185_p0), %vm482_vm14, 1.0, %v1048_v54 }
 0x35c   :  { %v539_v21 = vpop.permute.xlu2 (%p185_p0), %538 }
 0x35d   :  { %187 = sbr.rel (!%p185_p0) target bundleno = 166 (0xa6), region = 88  ;;  %vm541_vm2 = vcmp.eq.s32.totalorder (%p185_p0), %v539_v21, %v1294_v60 }
 0x360   : > { %v349_v56 = vpop.permute.xlu0 %348 }
 0x361   : > { %353 = vst.msk [vmem:[%s351_s29] sm:$0xff] %vm352_vm11, %v349_v56 }
 0x364   :  { %v713_v62 = vpop.permute.xlu2 %712 }
 0x365   :  { %vm717_vm3 = vcmp.eq.s32.totalorder %v713_v62, %v1294_v60 }
 0x368   :  { %v492_v5 = vld [vmem:[#allocation3 + $0x42] ss:$8 sm:$0xf]  ;;  %v374_v11 = vld [vmem:[#allocation3 + $0x40] ss:$8 sm:$0xf]  ;;  %v477_v22 = vpop.permute.xlu0 %476 }
 0x369   :  { %v493_v6 = vld [vmem:[#allocation3 + $0x42] ss:$8 sm:$0xf0]  ;;  %v375_v12 = vld [vmem:[#allocation3 + $0x40] ss:$8 sm:$0xf0]  ;;  %vm481_vm12 = vcmp.eq.s32.totalorder %v477_v22, %v1294_v60 }
 0x36a   :  { %v494_v7 = vor.u32 %v493_v6, %v492_v5  ;;  %v488_v8 = vld [vmem:[#allocation3 + $0x2] ss:$8 sm:$0xf]  ;;  %v376_v13 = vor.u32 %v375_v12, %v374_v11  ;;  %v433_v14 = vld [vmem:[#allocation3 + $0x41] ss:$8 sm:$0xf]  ;;  %v421_v5 = vpop.permute.xlu1 %420 }
 0x36b   :  { %v489_v9 = vld [vmem:[#allocation3 + $0x2] ss:$8 sm:$0xf0]  ;;  %v434_v15 = vld [vmem:[#allocation3 + $0x41] ss:$8 sm:$0xf0]  ;;  %vm423_vm5 = vcmp.eq.s32.totalorder %v421_v5, %v1294_v60 }
 0x36c   :  { %515 = vmatpush.msra.mxu2 %v494_v7  ;;  %v490_v10 = vor.u32 %v489_v9, %v488_v8  ;;  %v435_v16 = vor.u32 %v434_v15, %v433_v14  ;;  %v551_v17 = vld [vmem:[#allocation3 + $0x43] ss:$8 sm:$0xf]  ;;  %397 = vmatpush.msra.mxu0 %v376_v13  ;;  %v370_v20 = vld [vmem:[#allocation3] ss:$8 sm:$0xf]  ;;  %v654_v6 = vpop.permute.xlu2 %653 }
 0x36d   :  { %v552_v18 = vld [vmem:[#allocation3 + $0x43] ss:$8 sm:$0xf0]  ;;  %v371_v24 = vld [vmem:[#allocation3] ss:$8 sm:$0xf0]  ;;  %vm658_vm6 = vcmp.eq.s32.totalorder %v654_v6, %v1294_v60 }
 0x36e   :  { %516 = vmatpush.msra.mxu2 %v490_v10  ;;  %v553_v19 = vor.u32 %v552_v18, %v551_v17  ;;  %456 = vmatpush.msra.mxu1 %v435_v16  ;;  %v372_v25 = vor.u32 %v371_v24, %v370_v20  ;;  %v429_v26 = vld [vmem:[#allocation3 + $0x1] ss:$8 sm:$0xf]  ;;  %v547_v29 = vld [vmem:[#allocation3 + $0x3] ss:$8 sm:$0xf] }
 0x36f   :  { %v430_v27 = vld [vmem:[#allocation3 + $0x1] ss:$8 sm:$0xf0]  ;;  %v548_v30 = vld [vmem:[#allocation3 + $0x3] ss:$8 sm:$0xf0] }
 0x370   :  { %574 = vmatpush.msra.mxu3 %v553_v19  ;;  %v431_v28 = vor.u32 %v430_v27, %v429_v26  ;;  %398 = vmatpush.msra.mxu0 %v372_v25  ;;  %v549_v31 = vor.u32 %v548_v30, %v547_v29  ;;  %v728_v32 = vld [vmem:[#allocation3 + $0x46] ss:$8 sm:$0xf]  ;;  %v669_v39 = vld [vmem:[#allocation3 + $0x45] ss:$8 sm:$0xf]  ;;  %v536_v63 = vpop.permute.xlu0 %535 }
 0x371   :  { %v729_v33 = vld [vmem:[#allocation3 + $0x46] ss:$8 sm:$0xf0]  ;;  %v670_v40 = vld [vmem:[#allocation3 + $0x45] ss:$8 sm:$0xf0]  ;;  %887 = vmatmul.msk.f32.vlgmr.msra.gmra.mxu0 %vm49_vm0, %v885_v61  ;;  %vm540_vm15 = vcmp.eq.s32.totalorder %v536_v63, %v1294_v60 }
 0x372   :  { %457 = vmatpush.msra.mxu1 %v431_v28  ;;  %575 = vmatpush.msra.mxu3 %v549_v31  ;;  %v730_v34 = vor.u32 %v729_v33, %v728_v32  ;;  %v724_v35 = vld [vmem:[#allocation3 + $0x6] ss:$8 sm:$0xf]  ;;  %v671_v41 = vor.u32 %v670_v40, %v669_v39  ;;  %v610_v42 = vld [vmem:[#allocation3 + $0x44] ss:$8 sm:$0xf]  ;;  %v595_v12 = vpop.permute.xlu1 %594 }
 0x373   :  { %v725_v36 = vld [vmem:[#allocation3 + $0x6] ss:$8 sm:$0xf0]  ;;  %v611_v43 = vld [vmem:[#allocation3 + $0x44] ss:$8 sm:$0xf0]  ;;  %893 = vmatmul.msk.f32.vlgmr.msra.gmra.mxu1 %vm49_vm0, %v891_v2  ;;  %vm599_vm8 = vcmp.eq.s32.totalorder %v595_v12, %v1294_v60 }
 0x374   :  { %751 = vmatpush.msrb.mxu2 %v730_v34  ;;  %v726_v37 = vor.u32 %v725_v36, %v724_v35  ;;  %v612_v44 = vor.u32 %v611_v43, %v610_v42  ;;  %v787_v45 = vld [vmem:[#allocation3 + $0x47] ss:$8 sm:$0xf]  ;;  %692 = vmatpush.msrb.mxu1 %v671_v41  ;;  %v606_v48 = vld [vmem:[#allocation3 + $0x4] ss:$8 sm:$0xf]  ;;  %v598_v16 = vpop.permute.xlu2 %597 }
 0x375   :  { %v788_v46 = vld [vmem:[#allocation3 + $0x47] ss:$8 sm:$0xf0]  ;;  %v607_v49 = vld [vmem:[#allocation3 + $0x4] ss:$8 sm:$0xf0]  ;;  %vm600_vm9 = vcmp.eq.s32.totalorder %v598_v16, %v1294_v60 }
 0x376   :  { %752 = vmatpush.msrb.mxu2 %v726_v37  ;;  %v789_v47 = vor.u32 %v788_v46, %v787_v45  ;;  %633 = vmatpush.msrb.mxu0 %v612_v44  ;;  %v608_v51 = vor.u32 %v607_v49, %v606_v48  ;;  %v665_v52 = vld [vmem:[#allocation3 + $0x5] ss:$8 sm:$0xf]  ;;  %v783_v56 = vld [vmem:[#allocation3 + $0x7] ss:$8 sm:$0xf] }
 0x377   :  { %v666_v53 = vld [vmem:[#allocation3 + $0x5] ss:$8 sm:$0xf0]  ;;  %v784_v58 = vld [vmem:[#allocation3 + $0x7] ss:$8 sm:$0xf0] }
 0x378   :  { %810 = vmatpush.msrb.mxu3 %v789_v47  ;;  %634 = vmatpush.msrb.mxu0 %v608_v51  ;;  %v667_v57 = vor.u32 %v666_v53, %v665_v52  ;;  %v785_v59 = vor.u32 %v784_v58, %v783_v56  ;;  %v897_v55 = vsel %vm481_vm12, 1.0, %v1048_v54  ;;  %v903_v3 = vsel %vm540_vm15, 1.0, %v1048_v54  ;;  %v363_v4 = vpop.permute.xlu0 %362 }
 0x379   :  { %899 = vmatmul.msk.f32.vlgmr.msra.gmra.mxu2 %vm49_vm0, %v897_v55  ;;  %905 = vmatmul.msk.f32.vlgmr.msra.gmra.mxu3 %vm49_vm0, %v903_v3  ;;  %vm365_vm4 = vcmp.eq.s32.totalorder %v363_v4, %v1294_v60  ;;  %v892_v8 = vsel %vm423_vm5, 1.0, %v1048_v54  ;;  %v921_v9 = vsel %vm717_vm3, 1.0, %v1048_v54  ;;  %v904_v10 = vsel %vm541_vm2, 1.0, %v1048_v54 }
 0x37a   :  { %693 = vmatpush.msrb.mxu1 %v667_v57  ;;  %811 = vmatpush.msrb.mxu3 %v785_v59  ;;  %v886_v7 = vsel %vm365_vm4, 1.0, %v1048_v54  ;;  %v915_v13 = vsel %vm658_vm6, 1.0, %v1048_v54  ;;  %v909_v15 = vsel %vm599_vm8, 1.0, %v1048_v54  ;;  %v775_v18 = vpop.permute.xlu1 %774  ;;  %v910_v19 = vsel %vm600_vm9, 1.0, %v1048_v54 }
 0x37b   :  { %888 = vmatmul.msk.f32.gmra.mxu0 %vm49_vm0, %v886_v7  ;;  %894 = vmatmul.msk.f32.gmra.mxu1 %vm49_vm0, %v892_v8  ;;  %vm777_vm11 = vcmp.eq.s32.totalorder %v775_v18, %v1294_v60 }
 0x37c   :  { %v928_v24 = vsel %vm777_vm11, 1.0, %v1048_v54 }
 0x380   :  { %v772_v11 = vpop.permute.xlu0 %771 }
 0x381   :  { %900 = vmatmul.msk.f32.gmra.mxu2 %vm49_vm0, %v898_v1  ;;  %906 = vmatmul.msk.f32.gmra.mxu3 %vm49_vm0, %v904_v10  ;;  %vm776_vm7 = vcmp.eq.s32.totalorder %v772_v11, %v1294_v60 }
 0x382   :  { %v927_v14 = vsel %vm776_vm7, 1.0, %v1048_v54 }
 0x383   :  { %911 = vmatmul.msk.f32.vlgmr.msrb.gmra.mxu0 %vm49_vm0, %v909_v15  ;;  %917 = vmatmul.msk.f32.vlgmr.msrb.gmra.mxu1 %vm49_vm0, %v915_v13 }
 0x388   :  { %v716_v17 = vpop.permute.xlu0 %715 }
 0x389   :  { %923 = vmatmul.msk.f32.vlgmr.msrb.gmra.mxu2 %vm49_vm0, %v921_v9  ;;  %929 = vmatmul.msk.f32.vlgmr.msrb.gmra.mxu3 %vm49_vm0, %v927_v14  ;;  %vm718_vm10 = vcmp.eq.s32.totalorder %v716_v17, %v1294_v60 }
 0x38a   :  { %v922_v20 = vsel %vm718_vm10, 1.0, %v1048_v54 }
 0x38b   :  { %912 = vmatmul.msk.f32.gmra.mxu0 %vm49_vm0, %v910_v19 }
 0x390   :  { %v657_v25 = vpop.permute.xlu0 %656 }
 0x391   :  { %924 = vmatmul.msk.f32.gmra.mxu2 %vm49_vm0, %v922_v20  ;;  %930 = vmatmul.msk.f32.gmra.mxu3 %vm49_vm0, %v928_v24  ;;  %vm659_vm12 = vcmp.eq.s32.totalorder %v657_v25, %v1294_v60 }
 0x392   :  { %v916_v26 = vsel %vm659_vm12, 1.0, %v1048_v54 }
 0x393   :  { %918 = vmatmul.msk.f32.gmra.mxu1 %vm49_vm0, %v916_v26 }
 0x3ee   :  { %v400_v27 = vpop.f32.mrf.mxu0 }
 0x3ef   :  { %406 = vst.msk [vmem:[#allocation4] sm:$0xff] %vm49_vm0, %v400_v27 }
 0x3f0   :  { %v459_v29 = vpop.f32.mrf.mxu1 }
 0x3f1   :  { %466 = vst.msk [vmem:[#allocation4 + $0x8] sm:$0xff] %vm49_vm0, %v459_v29 }
 0x3f8   :  { %v403_v32 = vpop.f32.mrf.mxu0  ;;  %v462_v33 = vpop.f32.mrf.mxu1 }
 0x3f9   :  { %468 = vrot.lane.b32.xlu2 %v462_v33, %s1049_s1  ;;  %408 = vrot.lane.b32.xlu1 %v403_v32, %s1049_s1 }
 0x3fc   :  { %v518_v28 = vpop.f32.mrf.mxu2  ;;  %v577_v31 = vpop.f32.mrf.mxu3 }
 0x3fd   :  { %525 = vst.msk [vmem:[#allocation4 + $0x10] sm:$0xff] %vm49_vm0, %v518_v28 }
 0x3fe   :  { %584 = vst.msk [vmem:[#allocation4 + $0x18] sm:$0xff] %vm49_vm0, %v577_v31 }
 0x400   :  { %v636_v36 = vpop.f32.mrf.mxu0  ;;  %v695_v37 = vpop.f32.mrf.mxu1 }
 0x401   :  { %643 = vst.msk [vmem:[#allocation4 + $0x20] sm:$0xff] %vm49_vm0, %v636_v36 }
 0x402   :  { %702 = vst.msk [vmem:[#allocation4 + $0x28] sm:$0xff] %vm49_vm0, %v695_v37 }
 0x404   :  { %v521_v30 = vpop.f32.mrf.mxu2  ;;  %v580_v34 = vpop.f32.mrf.mxu3 }
 0x405   :  { %527 = vrot.lane.b32.xlu0 %v521_v30, %s1049_s1  ;;  %586 = vrot.lane.b32.xlu1 %v580_v34, %s1049_s1 }
 0x408   :  { %v639_v39 = vpop.f32.mrf.mxu0 }
 0x409   :  { %645 = vrot.lane.b32.xlu2 %v639_v39, %s1049_s1 }
 0x40c   :  { %v754_v35 = vpop.f32.mrf.mxu2  ;;  %v813_v38 = vpop.f32.mrf.mxu3 }
 0x40d   :  { %761 = vst.msk [vmem:[#allocation4 + $0x30] sm:$0xff] %vm49_vm0, %v754_v35 }
 0x40e   :  { %820 = vst.msk [vmem:[#allocation4 + $0x38] sm:$0xff] %vm49_vm0, %v813_v38 }
 0x410   :  { %v698_v42 = vpop.f32.mrf.mxu1 }
 0x411   :  { %704 = vrot.lane.b32.xlu0 %v698_v42, %s1049_s1 }
 0x414   :  { %v757_v40 = vpop.f32.mrf.mxu2  ;;  %v816_v41 = vpop.f32.mrf.mxu3 }
 0x415   :  { %763 = vrot.lane.b32.xlu1 %v757_v40, %s1049_s1  ;;  %822 = vrot.lane.b32.xlu2 %v816_v41, %s1049_s1 }
 0x453   :  { %v469_v43 = vpop.permute.xlu2 %468 }
 0x454   :  { %471 = vst.msk [vmem:[#allocation4 + $0x8] sm:$0xff] %vm411_vm13, %v469_v43 }
 0x463   :  { %v646_v44 = vpop.permute.xlu2 %645 }
 0x464   :  { %648 = vst.msk [vmem:[#allocation4 + $0x20] sm:$0xff] %vm411_vm13, %v646_v44 }
 0x46b   :  { %v409_v46 = vpop.permute.xlu1 %408 }
 0x46c   :  { %412 = vst.msk [vmem:[#allocation4] sm:$0xff] %vm411_vm13, %v409_v46 }
 0x46f   :  { %v823_v47 = vpop.permute.xlu2 %822 }
 0x470   :  { %825 = vst.msk [vmem:[#allocation4 + $0x38] sm:$0xff] %vm411_vm13, %v823_v47 }
 0x477   :  { %v528_v45 = vpop.permute.xlu0 %527  ;;  %v587_v48 = vpop.permute.xlu1 %586 }
 0x478   :  { %530 = vst.msk [vmem:[#allocation4 + $0x10] sm:$0xff] %vm411_vm13, %v528_v45 }
 0x479   :  { %589 = vst.msk [vmem:[#allocation4 + $0x18] sm:$0xff] %vm411_vm13, %v587_v48 }
 0x483   :  { %v705_v50 = vpop.permute.xlu0 %704 }
 0x484   :  { %707 = vst.msk [vmem:[#allocation4 + $0x28] sm:$0xff] %vm411_vm13, %v705_v50 }
 0x487   :  { %v764_v49 = vpop.permute.xlu1 %763 }
 0x488   :  { %766 = vst.msk [vmem:[#allocation4 + $0x30] sm:$0xff] %vm411_vm13, %v764_v49 }
 0x489   :  { %838 = dma.vmem_to_hbm [thread:$0]  %s831_s2, 1024, %s833_s13, [#allocation5], %s1051_s14, %s1051_s14, %s1052_s15  }
 0x48a   :  { %1026 = dma.done.wait [#allocation5], 1024  }
 0x48b   :  { %1027 = vsyncadd [#allocation5], 4294966272 }
 0x48c   :  { %843 = vsyncpa [#allocation5], 1 }

</bundles_post_ra>
